<compile_context>
chip_gen: v6e
topology: v6e:2x2x1
jax: 0.10.0
libtpu: 0.0.40
codegen_flags: <defaults>
</compile_context>

<pallas_src>
import functools

import jax
import jax.numpy as jnp
from jax.experimental import pallas as pl
from jax.experimental.pallas import tpu as pltpu


def _round_up(x, m):
    return (x + m - 1) // m * m


# ----------------------------------------------------------------------------
# Pallas kernel: the full MLP on one batch tile.
#   h_{l+1} = relu(h_l @ W'_l + shift'_l)   (no ReLU on the last layer)
# ----------------------------------------------------------------------------
def _fused_mlp_kernel(x_ref, w_ref, s_ref, o_ref):
    # x_ref: (TM, P)   bf16  input tile (features zero-padded to P lanes)
    # w_ref: (L, P, P) bf16  folded (BN-scaled) weights, zero-padded, resident
    # s_ref: (L, 1, P) f32   folded bias+BN shift, zero-padded, resident
    # o_ref: (TM, P)   f32   output tile
    n_layers = w_ref.shape[0]
    h = x_ref[...]                                                    # bf16
    for l in range(n_layers):                                         # static unroll (few layers)
        y = jnp.dot(h, w_ref[l], preferred_element_type=jnp.float32)  # MXU, f32 acc
        y = y + s_ref[l]                                              # f32 epilogue (VPU)
        if l < n_layers - 1:
            y = jnp.maximum(y, 0.0)                                   # ReLU
            h = y.astype(jnp.bfloat16)                                # bf16 for next MXU pass
        else:
            o_ref[...] = y                                            # lane-dense store


@functools.partial(jax.jit, static_argnames=("out_dim",))
def fused_mlp_forward(x, w_stack, s_stack, out_dim):
    """Run the fused MLP. x: (M, K) f32. Returns (M, out_dim) f32."""
    M, K = x.shape
    L, P, _ = w_stack.shape

    # Batch tiling: single tile for small batches, 256-row tiles otherwise
    # (256x128 tiles measured near the HBM roofline; bigger buys little here).
    if M <= 256:
        M_pad = _round_up(M, 8)
        TM = M_pad
    else:
        TM = 256
        M_pad = _round_up(M, TM)

    # Zero-pad batch rows and feature lanes; cast the matmul operand to bf16.
    x_pad = jnp.zeros((M_pad, P), jnp.bfloat16).at[:M, :K].set(
        x.astype(jnp.bfloat16))

    out = pl.pallas_call(
        _fused_mlp_kernel,
        out_shape=jax.ShapeDtypeStruct((M_pad, P), jnp.float32),
        grid=(M_pad // TM,),
        in_specs=[
            pl.BlockSpec((TM, P), lambda i: (i, 0)),        # x tile (pipelined)
            pl.BlockSpec((L, P, P), lambda i: (0, 0, 0)),   # all weights, resident
            pl.BlockSpec((L, 1, P), lambda i: (0, 0, 0)),   # all shifts, resident
        ],
        out_specs=pl.BlockSpec((TM, P), lambda i: (i, 0)),  # lane-dense output
        compiler_params=pltpu.CompilerParams(
            dimension_semantics=("parallel",),              # megacore-shard M
        ),
    )(x_pad, w_stack, s_stack)

    return out[:M, :out_dim]


# ----------------------------------------------------------------------------
# MLP module (parameter construction + BN/bias folding in plain JAX)
# ----------------------------------------------------------------------------
class MultiLayerPerceptron:
    def __init__(self, layer_dim_list, activation="relu", batch_norm=True,
                 dropout_p=0.0, *, key):
        assert activation == "relu", "only ReLU implemented"
        self.layer_dim_list = list(layer_dim_list)
        self.batch_norm = batch_norm
        self.dropout_p = dropout_p  # eval mode: dropout is identity
        # TODO(synk): training-mode dropout (pltpu.prng_*) and batch-statistic
        # BatchNorm are not implemented; this reproduces eval()-mode forward.
        self._create_mlp(key)

    def _create_mlp(self, key):
        eps = 1e-5
        dims = self.layer_dim_list
        n_layers = len(dims) - 1
        P = _round_up(max(dims), 128)       # common 128-lane padded width
        self.n_layers = n_layers
        self.padded_dim = P

        w_stack = jnp.zeros((n_layers, P, P), jnp.float32)
        s_stack = jnp.zeros((n_layers, 1, P), jnp.float32)

        for li in range(n_layers):
            d_in, d_out = dims[li], dims[li + 1]
            key, kw, kb, kg, kbt, km, kv = jax.random.split(key, 7)
            bound = 1.0 / jnp.sqrt(jnp.float32(d_in))
            w = jax.random.uniform(kw, (d_in, d_out), jnp.float32, -bound, bound)
            b = jax.random.uniform(kb, (1, d_out), jnp.float32, -bound, bound)
            is_last = li == n_layers - 1
            if self.batch_norm and not is_last:
                gamma = 1.0 + 0.1 * jax.random.normal(kg, (1, d_out), jnp.float32)
                beta = 0.1 * jax.random.normal(kbt, (1, d_out), jnp.float32)
                run_mean = 0.1 * jax.random.normal(km, (1, d_out), jnp.float32)
                run_var = jnp.abs(1.0 + 0.1 * jax.random.normal(
                    kv, (1, d_out), jnp.float32))
                scale = gamma / jnp.sqrt(run_var + eps)
                shift = beta - run_mean * scale
            else:
                scale = jnp.ones((1, d_out), jnp.float32)
                shift = jnp.zeros((1, d_out), jnp.float32)

            # Fold BN + bias:  (x@W + b)*scale + shift == x@(W*scale) + (b*scale+shift)
            w_fold = w * scale                        # (d_in, d_out)
            s_fold = b * scale + shift                # (1, d_out)

            # Zero-pad into the stacked, lane-aligned parameter slabs.
            w_stack = w_stack.at[li, :d_in, :d_out].set(w_fold)
            s_stack = s_stack.at[li, :, :d_out].set(s_fold)

        self.w_stack = w_stack.astype(jnp.bfloat16)   # bf16 MXU operands
        self.s_stack = s_stack                        # f32 epilogue shift

    def forward(self, x):
        return fused_mlp_forward(x, self.w_stack, self.s_stack,
                                 self.layer_dim_list[-1])

    # Pure-JAX reference mirroring the kernel math (bf16 matmul operands,
    # f32 accumulation / epilogue) for correctness checking.
    def forward_ref(self, x):
        dims = self.layer_dim_list
        h = x
        for li in range(self.n_layers):
            d_in, d_out = dims[li], dims[li + 1]
            w = self.w_stack[li, :d_in, :d_out]                   # bf16
            s = self.s_stack[li, :, :d_out]                       # f32
            y = jnp.dot(h.astype(jnp.bfloat16), w,
                        preferred_element_type=jnp.float32) + s
            if li < self.n_layers - 1:
                y = jnp.maximum(y, 0.0)
            h = y
        return h


# ----------------------------------------------------------------------------
if __name__ == "__main__":
    key = jax.random.PRNGKey(0)
    key, k_params, k_x = jax.random.split(key, 3)

    layer_dim_list = [32, 64, 48, 16]   # in -> hidden -> hidden -> out
    batch = 8

    mlp = MultiLayerPerceptron(layer_dim_list, activation="relu",
                               batch_norm=True, dropout_p=0.1, key=k_params)

    x = jax.random.normal(k_x, (batch, layer_dim_list[0]), jnp.float32)

    out = mlp.forward(x)
    out = jax.block_until_ready(out)

    ref = mlp.forward_ref(x)
    assert out.shape == (batch, layer_dim_list[-1])
    assert jnp.allclose(out, ref, atol=2e-2, rtol=2e-2), "mismatch vs reference"

    print("KERNEL_OK")
</pallas_src>

<mosaic_0001>
module attributes {stable_mosaic.version = 11 : i64} {
  func.func @_fused_mlp_kernel(%arg0: i32, %arg1: memref<8x128xbf16, #tpu.memory_space<vmem>>, %arg2: memref<3x128x128xbf16, #tpu.memory_space<vmem>>, %arg3: memref<3x1x128xf32, #tpu.memory_space<vmem>>, %arg4: memref<8x128xf32, #tpu.memory_space<vmem>>) attributes {dimension_semantics = [#tpu.dimension_semantics<parallel>], iteration_bounds = array<i64: 1>, scalar_prefetch = 0 : i64, scratch_operands = 0 : i64, tpu.core_type = #tpu.core_type<tc>, window_params = [{transform_indices = @transform_0, window_bounds = array<i64: 8, 128>}, {pipeline_mode = #tpu.pipeline_mode<synchronous>, transform_indices = @transform_1, window_bounds = array<i64: 3, 128, 128>}, {pipeline_mode = #tpu.pipeline_mode<synchronous>, transform_indices = @transform_2, window_bounds = array<i64: 3, 1, 128>}, {transform_indices = @transform_3, window_bounds = array<i64: 8, 128>}]} {
    %c0 = arith.constant 0 : index
    %c0_0 = arith.constant 0 : index
    %0 = vector.load %arg1[%c0, %c0_0] : memref<8x128xbf16, #tpu.memory_space<vmem>>, vector<8x128xbf16>
    %c0_1 = arith.constant 0 : index
    %c0_2 = arith.constant 0 : index
    %c0_3 = arith.constant 0 : index
    %1 = vector.load %arg2[%c0_1, %c0_2, %c0_3] : memref<3x128x128xbf16, #tpu.memory_space<vmem>>, vector<1x128x128xbf16>
    %2 = vector.shape_cast %1 : vector<1x128x128xbf16> to vector<128x128xbf16>
    %cst = arith.constant dense<0.000000e+00> : vector<8x128xf32>
    %3 = tpu.matmul %0, %2, %cst {dimension_numbers = #tpu.dot_dimension_numbers<[1], [0], [0], [1], [0, 0, 1, 1], [], []>} : vector<8x128xbf16>, vector<128x128xbf16>, vector<8x128xf32> -> vector<8x128xf32>
    %c0_4 = arith.constant 0 : index
    %c0_5 = arith.constant 0 : index
    %c0_6 = arith.constant 0 : index
    %4 = vector.load %arg3[%c0_4, %c0_5, %c0_6] : memref<3x1x128xf32, #tpu.memory_space<vmem>>, vector<1x1x128xf32>
    %5 = vector.shape_cast %4 : vector<1x1x128xf32> to vector<1x128xf32>
    %6 = vector.broadcast %5 : vector<1x128xf32> to vector<8x128xf32>
    %7 = arith.addf %3, %6 : vector<8x128xf32>
    %cst_7 = arith.constant 0.000000e+00 : f32
    %8 = vector.broadcast %cst_7 : f32 to vector<8x128xf32>
    %9 = arith.maximumf %7, %8 : vector<8x128xf32>
    %10 = arith.truncf %9 : vector<8x128xf32> to vector<8x128xbf16>
    %c1 = arith.constant 1 : index
    %c0_8 = arith.constant 0 : index
    %c0_9 = arith.constant 0 : index
    %11 = vector.load %arg2[%c1, %c0_8, %c0_9] : memref<3x128x128xbf16, #tpu.memory_space<vmem>>, vector<1x128x128xbf16>
    %12 = vector.shape_cast %11 : vector<1x128x128xbf16> to vector<128x128xbf16>
    %cst_10 = arith.constant dense<0.000000e+00> : vector<8x128xf32>
    %13 = tpu.matmul %10, %12, %cst_10 {dimension_numbers = #tpu.dot_dimension_numbers<[1], [0], [0], [1], [0, 0, 1, 1], [], []>} : vector<8x128xbf16>, vector<128x128xbf16>, vector<8x128xf32> -> vector<8x128xf32>
    %c1_11 = arith.constant 1 : index
    %c0_12 = arith.constant 0 : index
    %c0_13 = arith.constant 0 : index
    %14 = vector.load %arg3[%c1_11, %c0_12, %c0_13] : memref<3x1x128xf32, #tpu.memory_space<vmem>>, vector<1x1x128xf32>
    %15 = vector.shape_cast %14 : vector<1x1x128xf32> to vector<1x128xf32>
    %16 = vector.broadcast %15 : vector<1x128xf32> to vector<8x128xf32>
    %17 = arith.addf %13, %16 : vector<8x128xf32>
    %cst_14 = arith.constant 0.000000e+00 : f32
    %18 = vector.broadcast %cst_14 : f32 to vector<8x128xf32>
    %19 = arith.maximumf %17, %18 : vector<8x128xf32>
    %20 = arith.truncf %19 : vector<8x128xf32> to vector<8x128xbf16>
    %c2 = arith.constant 2 : index
    %c0_15 = arith.constant 0 : index
    %c0_16 = arith.constant 0 : index
    %21 = vector.load %arg2[%c2, %c0_15, %c0_16] : memref<3x128x128xbf16, #tpu.memory_space<vmem>>, vector<1x128x128xbf16>
    %22 = vector.shape_cast %21 : vector<1x128x128xbf16> to vector<128x128xbf16>
    %cst_17 = arith.constant dense<0.000000e+00> : vector<8x128xf32>
    %23 = tpu.matmul %20, %22, %cst_17 {dimension_numbers = #tpu.dot_dimension_numbers<[1], [0], [0], [1], [0, 0, 1, 1], [], []>} : vector<8x128xbf16>, vector<128x128xbf16>, vector<8x128xf32> -> vector<8x128xf32>
    %c2_18 = arith.constant 2 : index
    %c0_19 = arith.constant 0 : index
    %c0_20 = arith.constant 0 : index
    %24 = vector.load %arg3[%c2_18, %c0_19, %c0_20] : memref<3x1x128xf32, #tpu.memory_space<vmem>>, vector<1x1x128xf32>
    %25 = vector.shape_cast %24 : vector<1x1x128xf32> to vector<1x128xf32>
    %26 = vector.broadcast %25 : vector<1x128xf32> to vector<8x128xf32>
    %27 = arith.addf %23, %26 : vector<8x128xf32>
    %c0_21 = arith.constant 0 : index
    %c0_22 = arith.constant 0 : index
    %28 = vector.load %arg4[%c0_21, %c0_22] : memref<8x128xf32, #tpu.memory_space<vmem>>, vector<8x128xf32>
    tpu.vector_store %arg4[%c0_21, %c0_22], %27 {strides = array<i32>} : memref<8x128xf32, #tpu.memory_space<vmem>>, vector<8x128xf32>,
    return
  }
  func.func @transform_0(%arg0: i32) -> (i32, i32) {
    %c0_i32 = arith.constant 0 : i32
    %c0_i32_0 = arith.constant 0 : i32
    return %arg0, %c0_i32 : i32, i32
  }
  func.func @transform_1(%arg0: i32) -> (i32, i32, i32) {
    %c0_i32 = arith.constant 0 : i32
    %c0_i32_0 = arith.constant 0 : i32
    %c0_i32_1 = arith.constant 0 : i32
    %c0_i32_2 = arith.constant 0 : i32
    return %c0_i32, %c0_i32_0, %c0_i32_1 : i32, i32, i32
  }
  func.func @transform_2(%arg0: i32) -> (i32, i32, i32) {
    %c0_i32 = arith.constant 0 : i32
    %c0_i32_0 = arith.constant 0 : i32
    %c0_i32_1 = arith.constant 0 : i32
    %c0_i32_2 = arith.constant 0 : i32
    return %c0_i32, %c0_i32_0, %c0_i32_1 : i32, i32, i32
  }
  func.func @transform_3(%arg0: i32) -> (i32, i32) {
    %c0_i32 = arith.constant 0 : i32
    %c0_i32_0 = arith.constant 0 : i32
    return %arg0, %c0_i32 : i32, i32
  }
}

</mosaic_0001>

<bundles_post_ra>
// kernel: fused_mlp_forward.1
= control target key start
LH: loop header
LB: loop body
LE: loop exit
PB: predicated region body
PF: predicated region fallthrough
CT: control target
= control target key end

     0   :  { %8 = vsyncpa [#allocation3], 0  ;;  %s652_s0 = inlined_call_operand.vmem [shape: bf16[8,128], index: 0, kind: input, shape index: {}]   ;;  %s653_s1 = inlined_call_operand.hbm [shape: bf16[3,128,128], index: 1, kind: input, shape index: {}]   ;;  %s654_s2 = inlined_call_operand.vmem [shape: f32[3,1,128], index: 2, kind: input, shape index: {}]   ;;  %s655_s3 = inlined_call_operand.hbm [shape: f32[8,128], index: 3, kind: output, shape index: {}]  }
   0x1   :  { %9 = vsyncpa [#allocation4], 0  ;;  %s578_s12 = smov [#allocation2]  }
   0x2   :  { %s17_s13 = sshll.u32 %s578_s12, 4  ;;  %s18_s13 = int_to_ptr.vmem [resolvable:$true] %s17_s13 }
   0x3   :  { %s542_s14 = scalar_lea.vmem %s18_s13, 3072  ;;  %p547_p1 = scmp.lt.s32.totalorder %s18_s13, %s18_s13 }
   0x4   :  { %p543_p0 = scmp.ne.s32.totalorder %s18_s13, %s542_s14  ;;  %p548_p2 = scmp.lt.s32.totalorder %s542_s14, %s542_s14 }
   0x6   :  { %p549_p3 = por %p548_p2, %p547_p1 }
   0x8   :  { %p550_p4 = pnand %p549_p3, %p543_p0 }
   0xa   :  { %553 = shalt.err (!%p550_p4)
}
   0xb   :  { %s579_s15 = smov 64   ;;  %s580_s16 = smov 4  }
   0xc   :  { %23 = dma.hbm_to_vmem [thread:$0]  %s653_s1, 3072, %s18_s13, [#allocation3], %s579_s15, %s579_s15, %s580_s16  }
   0xd   :  { %574 = dma.done.wait [#allocation3], 3072  }
   0xe   :  { %575 = vsyncadd [#allocation3], 4294964224  ;;  %v581_v0 = vmov 0.0   ;;  %vm582_vm0 = vmmov 0   ;;  %v510_v1 = vld [vmem:[#allocation2 + $0x38] sm:$0xff]   ;;  %v511_v2 = vld [vmem:[#allocation2 + $0x30] sm:$0xff]  }
   0xf   :  { %444 = vmatprep.subr.bf16.mxu0 %v581_v0  ;;  %460 = vmatprep.mubr.msk.bf16.mxu0 %vm582_vm0, %v581_v0  ;;  %v512_v3 = vld [vmem:[#allocation2 + $0x28] sm:$0xff]   ;;  %v518_v4 = vld [vmem:[#allocation2 + $0x78] sm:$0xff]   ;;  %v513_v5 = vld [vmem:[#allocation2 + $0x20] sm:$0xff]   ;;  %s583_s25 = smov [#allocation5]  }
  0x10   :  { %464 = vmatprep.subr.bf16.mxu1 %v581_v0  ;;  %480 = vmatprep.mubr.msk.bf16.mxu1 %vm582_vm0, %v581_v0  ;;  %v519_v6 = vld [vmem:[#allocation2 + $0x70] sm:$0xff]   ;;  %v514_v7 = vld [vmem:[#allocation2 + $0x18] sm:$0xff]   ;;  %v520_v8 = vld [vmem:[#allocation2 + $0x68] sm:$0xff]   ;;  %s379_s26 = sshll.u32 %s583_s25, 4  ;;  %s380_s26 = int_to_ptr.vmem [resolvable:$true] %s379_s26 }
  0x11   :  { %445 = vmatpush3.bf16.msra.mxu0 %v510_v1  ;;  %465 = vmatpush3.bf16.msra.mxu1 %v518_v4  ;;  %v515_v9 = vld [vmem:[#allocation2 + $0x10] sm:$0xff]   ;;  %v521_v10 = vld [vmem:[#allocation2 + $0x60] sm:$0xff]   ;;  %v516_v11 = vld [vmem:[#allocation2 + $0x8] sm:$0xff]   ;;  %s554_s27 = scalar_lea.vmem %s380_s26, 128  ;;  %p559_p6 = scmp.lt.s32.totalorder %s380_s26, %s380_s26 }
  0x12   :  { %446 = vmatprep.subr.bf16.mxu0 %v581_v0  ;;  %466 = vmatprep.subr.bf16.mxu1 %v581_v0  ;;  %v522_v12 = vld [vmem:[#allocation2 + $0x58] sm:$0xff]   ;;  %v517_v13 = vld [vmem:[#allocation2] sm:$0xff]   ;;  %v523_v14 = vld [vmem:[#allocation2 + $0x50] sm:$0xff]   ;;  %p555_p5 = scmp.ne.s32.totalorder %s380_s26, %s554_s27  ;;  %p560_p7 = scmp.lt.s32.totalorder %s554_s27, %s554_s27 }
  0x13   :  { %v30_v15 = vld [vmem:[%s652_s0] sm:$0xf]  ;;  %v524_v16 = vld [vmem:[#allocation2 + $0x48] sm:$0xff]   ;;  %v526_v18 = vld [vmem:[#allocation2 + $0xb8] sm:$0xff]  }
  0x14   :  { %v525_v17 = vld [vmem:[#allocation2 + $0x40] sm:$0xff]   ;;  %v527_v19 = vld [vmem:[#allocation2 + $0xb0] sm:$0xff]   ;;  %v528_v20 = vld [vmem:[#allocation2 + $0xa8] sm:$0xff]   ;;  %p561_p8 = por %p560_p7, %p559_p6 }
  0x15   :  { %447 = vmatpush3.bf16.msra.mxu0 %v511_v2  ;;  %467 = vmatpush3.bf16.msra.mxu1 %v519_v6  ;;  %v529_v21 = vld [vmem:[#allocation2 + $0xa0] sm:$0xff]   ;;  %v530_v22 = vld [vmem:[#allocation2 + $0x98] sm:$0xff]   ;;  %v531_v23 = vld [vmem:[#allocation2 + $0x90] sm:$0xff]  }
  0x16   :  { %448 = vmatprep.subr.bf16.mxu0 %v581_v0  ;;  %468 = vmatprep.subr.bf16.mxu1 %v581_v0  ;;  %v388_v24 = vld [vmem:[%s654_s2] ss:$0 sm:$0xff]  ;;  %v532_v32 = vld [vmem:[#allocation2 + $0x88] sm:$0xff]   ;;  %v398_v34 = vld [vmem:[%s654_s2 + $0x1] ss:$0 sm:$0xff]  ;;  %p562_p9 = pnand %p561_p8, %p555_p5 }
  0x17   :  { %v533_v33 = vld [vmem:[#allocation2 + $0x80] sm:$0xff]  }
  0x18   :  { %v408_v42 = vld [vmem:[%s654_s2 + $0x2] ss:$0 sm:$0xff] }
  0x19   :  { %449 = vmatpush3.bf16.msra.mxu0 %v512_v3  ;;  %469 = vmatpush3.bf16.msra.mxu1 %v520_v8 }
  0x1a   :  { %450 = vmatprep.subr.bf16.mxu0 %v581_v0  ;;  %470 = vmatprep.subr.bf16.mxu1 %v581_v0 }
  0x1d   :  { %451 = vmatpush3.bf16.msra.mxu0 %v513_v5  ;;  %471 = vmatpush3.bf16.msra.mxu1 %v521_v10 }
  0x1e   :  { %452 = vmatprep.subr.bf16.mxu0 %v581_v0  ;;  %472 = vmatprep.subr.bf16.mxu1 %v581_v0 }
  0x21   :  { %453 = vmatpush3.bf16.msra.mxu0 %v514_v7  ;;  %473 = vmatpush3.bf16.msra.mxu1 %v522_v12 }
  0x22   :  { %454 = vmatprep.subr.bf16.mxu0 %v581_v0  ;;  %474 = vmatprep.subr.bf16.mxu1 %v581_v0 }
  0x25   :  { %455 = vmatpush3.bf16.msra.mxu0 %v515_v9  ;;  %475 = vmatpush3.bf16.msra.mxu1 %v523_v14 }
  0x26   :  { %456 = vmatprep.subr.bf16.mxu0 %v581_v0  ;;  %476 = vmatprep.subr.bf16.mxu1 %v581_v0 }
  0x29   :  { %457 = vmatpush3.bf16.msra.mxu0 %v516_v11  ;;  %477 = vmatpush3.bf16.msra.mxu1 %v524_v16 }
  0x2a   :  { %458 = vmatprep.subr.bf16.mxu0 %v581_v0  ;;  %478 = vmatprep.subr.bf16.mxu1 %v581_v0 }
  0x2d   :  { %459 = vmatpush3.bf16.msra.mxu0 %v517_v13  ;;  %479 = vmatpush3.bf16.msra.mxu1 %v525_v17 }
  0x2e   :  { %484 = vmatprep.subr.bf16.mxu0 %v581_v0 }
  0x30   :  { %461 = vmatmul.mubr.bf16.vlgmr.msra.gmra.mxu0 %v30_v15 }
  0x31   :  { %500 = vmatprep.mubr.msk.bf16.mxu0 %vm582_vm0, %v581_v0  ;;  %485 = vmatpush3.bf16.msra.mxu0 %v526_v18 }
  0x32   :  { %486 = vmatprep.subr.bf16.mxu0 %v581_v0 }
  0x35   :  { %487 = vmatpush3.bf16.msra.mxu0 %v527_v19 }
  0x36   :  { %488 = vmatprep.subr.bf16.mxu0 %v581_v0 }
  0x39   :  { %489 = vmatpush3.bf16.msra.mxu0 %v528_v20 }
  0x3a   :  { %490 = vmatprep.subr.bf16.mxu0 %v581_v0 }
  0x3d   :  { %491 = vmatpush3.bf16.msra.mxu0 %v529_v21 }
  0x3e   :  { %492 = vmatprep.subr.bf16.mxu0 %v581_v0 }
  0x41   :  { %493 = vmatpush3.bf16.msra.mxu0 %v530_v22 }
  0x42   :  { %494 = vmatprep.subr.bf16.mxu0 %v581_v0 }
  0x45   :  { %495 = vmatpush3.bf16.msra.mxu0 %v531_v23 }
  0x46   :  { %496 = vmatprep.subr.bf16.mxu0 %v581_v0 }
  0x49   :  { %497 = vmatpush3.bf16.msra.mxu0 %v532_v32 }
  0x4a   :  { %498 = vmatprep.subr.bf16.mxu0 %v581_v0 }
  0x4d   :  { %499 = vmatpush3.bf16.msra.mxu0 %v533_v33 }
  0xf0   :  { %v136_v25 = vpop.f32.mrf.mxu0 }
  0xf1   :  { %v137_v26 = vadd.f32 %v388_v24, %v136_v25 }
  0xf2   :  { %v462_v27 = vpop.f32.mrf.mxu0 }
  0xf3   :  { %v142_v28 = vmax.f32 %v137_v26, 0.0 }
  0xf4   :  { %v139_v29 = vpop.f32.mrf.mxu0 }
  0xf5   :  { %v143_v30 = vpack.c.bf16 %v142_v28, %v142_v28 }
  0xf6   :  { %v463_v31 = vpop.f32.mrf.mxu0 }
  0xf7   :  { %481 = vmatmul.mubr.bf16.vlgmr.msra.gmra.mxu1 %v143_v30 }
 0x1b7   :  { %v251_v35 = vpop.f32.mrf.mxu1 }
 0x1b8   :  { %v252_v36 = vadd.f32 %v398_v34, %v251_v35 }
 0x1b9   :  { %v482_v37 = vpop.f32.mrf.mxu1 }
 0x1ba   :  { %v257_v38 = vmax.f32 %v252_v36, 0.0 }
 0x1bb   :  { %v254_v39 = vpop.f32.mrf.mxu1 }
 0x1bc   :  { %v258_v40 = vpack.c.bf16 %v257_v38, %v257_v38 }
 0x1bd   :  { %v483_v41 = vpop.f32.mrf.mxu1 }
 0x1be   :  { %501 = vmatmul.mubr.bf16.vlgmr.msra.gmra.mxu0 %v258_v40 }
 0x27e   :  { %v366_v43 = vpop.f32.mrf.mxu0 }
 0x27f   :  { %v367_v44 = vadd.f32 %v408_v42, %v366_v43 }
 0x280   :  { %v502_v45 = vpop.f32.mrf.mxu0 }
 0x281   :  { %372 = vst [vmem:[#allocation5] sm:$0xff] %v367_v44 }
 0x282   :  { %v369_v46 = vpop.f32.mrf.mxu0 }
 0x283   :  { %565 = shalt.err (!%p562_p9)
}
 0x284   :  { %382 = dma.vmem_to_hbm [thread:$0]  %s380_s26, 128, %s655_s3, [#allocation4]   ;;  %v503_v47 = vpop.f32.mrf.mxu0 }
 0x285   :  { %576 = dma.done.wait [#allocation4], 128  }
 0x286   :  { %577 = vsyncadd [#allocation4], 4294967168 }
 0x287   :  { %386 = vsyncpa [#allocation3], 1 }
 0x288   :  { %387 = vsyncpa [#allocation4], 1 }

</bundles_post_ra>
